<compile_context>
chip_gen: v7x
topology: tpu7x:2x2x1
jax: 0.10.0
libtpu: 0.0.40
codegen_flags: <defaults>
</compile_context>

<pallas_src>
import jax
import jax.numpy as jnp
from jax import lax
from jax.experimental import pallas as pl
from jax.experimental.pallas import tpu as pltpu


# ------------------------------- tiling helpers --------------------------------

def _pick_tile(dim, target, align):
    """Largest `align`-aligned tile <= target that evenly divides dim; else full dim."""
    if dim <= target:
        return dim
    t = (target // align) * align
    while t >= align:
        if dim % t == 0:
            return t
        t -= align
    return dim


# ----------------------------- noise = coeffs @ Q.T -----------------------------

def _noise_matmul_kernel(coeff_ref, q_ref, noise_ref, acc_ref):
    # coeff_ref: (TS, TK) uniform coefficients
    # q_ref:     (TH, TK) rows of Q (transposed in-register; no HBM transpose of Q)
    # noise_ref: (TS, TH) output noise tile
    # acc_ref:   (TS, TH) f32 accumulator, resident across the K reduction axis
    @pl.when(pl.program_id(2) == 0)
    def _():
        acc_ref[...] = jnp.zeros_like(acc_ref)

    acc_ref[...] += jnp.dot(coeff_ref[...], q_ref[...].T,
                            preferred_element_type=jnp.float32)

    @pl.when(pl.program_id(2) == pl.num_programs(2) - 1)
    def _():
        noise_ref[...] = acc_ref[...].astype(noise_ref.dtype)


def _compute_noise(coeffs, Q, *, ts, th, tk):
    """coeffs: (S, K); Q: (H, K) -> noise (S, H) f32, computed once (amortized over B)."""
    S, K = coeffs.shape
    H = Q.shape[0]
    cost = pl.CostEstimate(flops=2 * S * K * H,
                           transcendentals=0,
                           bytes_accessed=4 * (S * K + K * H + S * H))
    return pl.pallas_call(
        _noise_matmul_kernel,
        out_shape=jax.ShapeDtypeStruct((S, H), jnp.float32),
        grid_spec=pltpu.PrefetchScalarGridSpec(
            num_scalar_prefetch=0,
            grid=(S // ts, H // th, K // tk),  # reduction axis (K) innermost
            in_specs=[
                pl.BlockSpec((ts, tk), lambda si, hi, k: (si, k)),  # coeffs
                pl.BlockSpec((th, tk), lambda si, hi, k: (hi, k)),  # Q rows
            ],
            out_specs=pl.BlockSpec((ts, th), lambda si, hi, k: (si, hi)),
            scratch_shapes=[pltpu.VMEM((ts, th), jnp.float32)],
        ),
        compiler_params=pltpu.CompilerParams(
            dimension_semantics=("parallel", "parallel", "arbitrary"),
            vmem_limit_bytes=32 * 1024 * 1024),
        cost_estimate=cost,
    )(coeffs, Q)


# --------------------------- out = hidden + noise[None] --------------------------

def _broadcast_add_kernel(noise_ref, h_ref, o_ref):
    # noise_ref: (TS, TH) f32, stays resident in VMEM across the batch axis
    # h_ref/o_ref: (TS, TH) (batch dim squeezed away by the BlockSpec)
    o_ref[...] = (h_ref[...].astype(jnp.float32) + noise_ref[...]).astype(o_ref.dtype)


def _broadcast_add(hidden_states, noise, *, ts, th):
    B, S, H = hidden_states.shape
    itemsize = jnp.dtype(hidden_states.dtype).itemsize
    cost = pl.CostEstimate(flops=B * S * H,
                           transcendentals=0,
                           bytes_accessed=2 * B * S * H * itemsize + 4 * S * H)
    return pl.pallas_call(
        _broadcast_add_kernel,
        out_shape=jax.ShapeDtypeStruct((B, S, H), hidden_states.dtype),
        grid_spec=pltpu.PrefetchScalarGridSpec(
            num_scalar_prefetch=0,
            # batch innermost: noise tile is fetched once per (si, hi) and reused B times
            grid=(S // ts, H // th, B),
            in_specs=[
                pl.BlockSpec((ts, th), lambda si, hi, b: (si, hi)),                 # noise
                pl.BlockSpec((pl.Squeezed(), ts, th), lambda si, hi, b: (b, si, hi)),  # hidden
            ],
            out_specs=pl.BlockSpec((pl.Squeezed(), ts, th),
                                   lambda si, hi, b: (b, si, hi)),
        ),
        compiler_params=pltpu.CompilerParams(
            dimension_semantics=("parallel", "parallel", "arbitrary"),
            vmem_limit_bytes=32 * 1024 * 1024),
        cost_estimate=cost,
    )(noise, hidden_states)


def probe_subspace_noise_forward(hidden_states, Q, coeffs):
    """hidden_states: (B, S, H); Q: (H, K); coeffs: (S, K) ~ U(-a, a)."""
    B, S, H = hidden_states.shape
    K = Q.shape[1]

    # Tile targets sized for a <=32 MiB scoped-VMEM budget (fits all TPU generations).
    ts = _pick_tile(S, 256, 8)
    th = _pick_tile(H, 512, 128)
    tk = _pick_tile(K, 512, 128)
    # TODO(synk): if a model's hidden size is not a multiple of 128, pad H on the
    # wrapper side for lane-dense stores; the demo shapes use full-array blocks instead.

    noise = _compute_noise(coeffs, Q, ts=ts, th=th, tk=tk)      # (S, H) f32, once
    return _broadcast_add(hidden_states, noise, ts=ts, th=th)   # (B, S, H)


# ------------------------------ init-time glue ----------------------------------

def orth_compl(A):
    """A: (hidden, r). Returns (orthonormal range basis, orthonormal complement basis).

    Init-time only (mirrors the numpy computation in the PyTorch __init__). Uses host
    float()/int() so it must NOT be wrapped in jax.jit.
    """
    U, s, _ = jnp.linalg.svd(A, full_matrices=True)
    tol = float(s.max()) * max(A.shape) * float(jnp.finfo(A.dtype).eps)
    rank = int(jnp.sum(s > tol))
    return U[:, :rank], U[:, rank:]


if __name__ == "__main__":
    key = jax.random.PRNGKey(0)
    k_probe, k_hidden, k_coeff = jax.random.split(key, 3)

    # Small shapes consistent with the module's forward (batch, seq, hidden):
    B, S, H = 2, 8, 32
    n_classes = 2                # probe_weight is a linear-probe weight (n_classes, hidden)
    a = 50.0

    probe_weight = jax.random.normal(k_probe, (n_classes, H), dtype=jnp.float32)

    # use_complement=True  ->  Q = orth_compl(probe_weight.T)[1], shape (H, H - rank)
    _, Q = orth_compl(probe_weight.T)

    hidden_states = jax.random.normal(k_hidden, (B, S, H), dtype=jnp.float32)

    # sample_subspace_noise: uniform coefficients in [-a, a] per (seq position, basis vector).
    # TODO(synk): PyTorch uses numpy's global RNG; exact bit-stream cannot be reproduced,
    # so a deterministic JAX PRNG key is used instead.
    coeffs = jax.random.uniform(k_coeff, (S, Q.shape[1]),
                                minval=-a, maxval=a, dtype=jnp.float32)

    out = probe_subspace_noise_forward(hidden_states, Q, coeffs)
    jax.block_until_ready(out)

    # Reference check against plain-JAX semantics of the PyTorch forward.
    ref = hidden_states + (coeffs @ Q.T)[None]
    assert out.shape == hidden_states.shape
    assert jnp.allclose(out, ref, atol=1e-3, rtol=1e-3)

    print("KERNEL_OK")
</pallas_src>

<mosaic_0001>
module attributes {stable_mosaic.version = 11 : i64} {
  func.func @_noise_matmul_kernel(%arg0: i32, %arg1: i32, %arg2: i32, %arg3: memref<8x30xf32, #tpu.memory_space<vmem>>, %arg4: memref<32x30xf32, #tpu.memory_space<vmem>>, %arg5: memref<8x32xf32, #tpu.memory_space<vmem>>, %arg6: memref<8x32xf32, #tpu.memory_space<vmem>>) attributes {dimension_semantics = [#tpu.dimension_semantics<parallel>, #tpu.dimension_semantics<parallel>, #tpu.dimension_semantics<arbitrary>], iteration_bounds = array<i64: 1, 1, 1>, scalar_prefetch = 0 : i64, scratch_operands = 1 : i64, tpu.core_type = #tpu.core_type<tc>, window_params = [{transform_indices = @transform_0, window_bounds = array<i64: 8, 30>}, {transform_indices = @transform_1, window_bounds = array<i64: 32, 30>}, {transform_indices = @transform_2, window_bounds = array<i64: 8, 32>}]} {
    %c0_i32 = arith.constant 0 : i32
    %0 = arith.cmpi eq, %arg2, %c0_i32 : i32
    %1 = arith.extui %0 : i1 to i32
    %c0_i32_0 = arith.constant 0 : i32
    %2 = arith.cmpi ne, %1, %c0_i32_0 : i32
    scf.if %2 {
      %cst_10 = arith.constant 0.000000e+00 : f32
      %13 = vector.broadcast %cst_10 : f32 to vector<8x32xf32>
      %c0_11 = arith.constant 0 : index
      %c0_12 = arith.constant 0 : index
      %14 = vector.load %arg6[%c0_11, %c0_12] : memref<8x32xf32, #tpu.memory_space<vmem>>, vector<8x32xf32>
      tpu.vector_store %arg6[%c0_11, %c0_12], %13 {strides = array<i32>} : memref<8x32xf32, #tpu.memory_space<vmem>>, vector<8x32xf32>,
    } else {
    }
    %c0 = arith.constant 0 : index
    %c0_1 = arith.constant 0 : index
    %3 = vector.load %arg6[%c0, %c0_1] : memref<8x32xf32, #tpu.memory_space<vmem>>, vector<8x32xf32>
    %c0_2 = arith.constant 0 : index
    %c0_3 = arith.constant 0 : index
    %4 = vector.load %arg3[%c0_2, %c0_3] : memref<8x30xf32, #tpu.memory_space<vmem>>, vector<8x30xf32>
    %c0_4 = arith.constant 0 : index
    %c0_5 = arith.constant 0 : index
    %5 = vector.load %arg4[%c0_4, %c0_5] : memref<32x30xf32, #tpu.memory_space<vmem>>, vector<32x30xf32>
    %6 = tpu.transpose %5, [1, 0] : vector<32x30xf32> -> vector<30x32xf32>
    %cst = arith.constant dense<0.000000e+00> : vector<8x32xf32>
    %7 = tpu.matmul %4, %6, %cst {dimension_numbers = #tpu.dot_dimension_numbers<[1], [0], [0], [1], [0, 0, 1, 1], [], []>} : vector<8x30xf32>, vector<30x32xf32>, vector<8x32xf32> -> vector<8x32xf32>
    %8 = arith.addf %3, %7 : vector<8x32xf32>
    %c0_6 = arith.constant 0 : index
    %c0_7 = arith.constant 0 : index
    %9 = vector.load %arg6[%c0_6, %c0_7] : memref<8x32xf32, #tpu.memory_space<vmem>>, vector<8x32xf32>
    tpu.vector_store %arg6[%c0_6, %c0_7], %8 {strides = array<i32>} : memref<8x32xf32, #tpu.memory_space<vmem>>, vector<8x32xf32>,
    %c0_i32_8 = arith.constant 0 : i32
    %10 = arith.cmpi eq, %arg2, %c0_i32_8 : i32
    %11 = arith.extui %10 : i1 to i32
    %c0_i32_9 = arith.constant 0 : i32
    %12 = arith.cmpi ne, %11, %c0_i32_9 : i32
    scf.if %12 {
      %c0_10 = arith.constant 0 : index
      %c0_11 = arith.constant 0 : index
      %13 = vector.load %arg6[%c0_10, %c0_11] : memref<8x32xf32, #tpu.memory_space<vmem>>, vector<8x32xf32>
      %c0_12 = arith.constant 0 : index
      %c0_13 = arith.constant 0 : index
      %14 = vector.load %arg5[%c0_12, %c0_13] : memref<8x32xf32, #tpu.memory_space<vmem>>, vector<8x32xf32>
      tpu.vector_store %arg5[%c0_12, %c0_13], %13 {strides = array<i32>} : memref<8x32xf32, #tpu.memory_space<vmem>>, vector<8x32xf32>,
    } else {
    }
    return
  }
  func.func @transform_0(%arg0: i32, %arg1: i32, %arg2: i32) -> (i32, i32) {
    %c0_i32 = arith.constant 0 : i32
    return %arg0, %arg2 : i32, i32
  }
  func.func @transform_1(%arg0: i32, %arg1: i32, %arg2: i32) -> (i32, i32) {
    %c0_i32 = arith.constant 0 : i32
    return %arg1, %arg2 : i32, i32
  }
  func.func @transform_2(%arg0: i32, %arg1: i32, %arg2: i32) -> (i32, i32) {
    %c0_i32 = arith.constant 0 : i32
    return %arg0, %arg1 : i32, i32
  }
}

</mosaic_0001>

<bundles_post_ra>
// kernel: tpu_custom_call.1
= control target key start
LH: loop header
LB: loop body
LE: loop exit
PB: predicated region body
PF: predicated region fallthrough
CT: control target
= control target key end

     0   :  { %7 = vsyncpa [#allocation4], 0  ;;  %s338_s0 = inlined_call_operand.hbm [shape: f32[8,30], index: 0, kind: input, shape index: {}]   ;;  %s339_s1 = inlined_call_operand.hbm [shape: f32[32,30], index: 1, kind: input, shape index: {}]   ;;  %s340_s2 = inlined_call_operand.hbm [shape: f32[8,32], index: 2, kind: output, shape index: {}]  }
   0x1   :  { %8 = vsyncpa [#allocation7], 0 }
   0x2   :  { %9 = vsyncpa [#allocation5], 0  ;;  %s269_s9 = smov [#allocation3]   ;;  %s270_s11 = smov [#allocation6]  }
   0x3   :  { %s16_s10 = sshll.u32 %s269_s9, 4  ;;  %s25_s12 = sshll.u32 %s270_s11, 4  ;;  %s17_s10 = int_to_ptr.vmem [resolvable:$true] %s16_s10  ;;  %s292_s12 = int_to_ptr.vmem [resolvable:$true] %s25_s12 }
   0x4   :  { %s197_s15 = scalar_lea.hbm %s338_s0, 128 }
   0x5   :  { %p198_p0 = scmp.ne.s32.totalorder %s338_s0, %s197_s15  ;;  %p201_p1 = scmp.lt.u32.totalorder %s197_s15, %s338_s0 }
   0x7   :  { %p203_p2 = pnand %p201_p1, %p198_p0 }
   0x9   :  { %206 = shalt.err (!%p203_p2)
}
   0xa   :  { %s207_s20 = scalar_lea.vmem %s17_s10, 128  ;;  %p212_p4 = scmp.lt.s32.totalorder %s17_s10, %s17_s10 }
   0xb   :  { %p208_p3 = scmp.ne.s32.totalorder %s17_s10, %s207_s20  ;;  %p213_p5 = scmp.lt.s32.totalorder %s207_s20, %s207_s20 }
   0xd   :  { %p214_p6 = por %p213_p5, %p212_p4 }
   0xf   :  { %p215_p7 = pnand %p214_p6, %p208_p3 }
  0x11   :  { %218 = shalt.err (!%p215_p7)
}
  0x12   :  { %19 = dma.hbm_to_vmem [thread:$0]  %s338_s0, 128, %s17_s10, [#allocation4]  }
  0x13   :  { %s219_s25 = scalar_lea.hbm %s339_s1, 512 }
  0x14   :  { %p220_p8 = scmp.ne.s32.totalorder %s339_s1, %s219_s25  ;;  %p223_p9 = scmp.lt.u32.totalorder %s219_s25, %s339_s1 }
  0x16   :  { %p225_p10 = pnand %p223_p9, %p220_p8 }
  0x18   :  { %228 = shalt.err (!%p225_p10)
}
  0x19   :  { %s229_s30 = scalar_lea.vmem %s292_s12, 512  ;;  %p234_p12 = scmp.lt.s32.totalorder %s292_s12, %s292_s12 }
  0x1a   :  { %p230_p11 = scmp.ne.s32.totalorder %s292_s12, %s229_s30  ;;  %p235_p13 = scmp.lt.s32.totalorder %s229_s30, %s229_s30 }
  0x1c   :  { %p236_p0 = por %p235_p13, %p234_p12 }
  0x1e   :  { %p237_p1 = pnand %p236_p0, %p230_p11 }
  0x20   :  { %240 = shalt.err (!%p237_p1)
}
  0x21   :  { %s271_s0 = smov 128   ;;  %s272_s3 = smov 8  }
  0x22   :  { %31 = dma.hbm_to_vmem [thread:$0]  %s339_s1, 512, %s292_s12, [#allocation7], %s271_s0, %s271_s0, %s272_s3  }
  0x23   :  { %263 = dma.done.wait [#allocation4], 128  }
  0x24   :  { %264 = vsyncadd [#allocation4], 4294967168 }
  0x25   :  { %265 = dma.done.wait [#allocation7], 512  }
  0x26   :  { %266 = vsyncadd [#allocation7], 4294966784  ;;  %vm42_vm0 = vcmask 261120   ;;  %v273_v0 = vmov 0.0|0.0   ;;  %v274_v1 = vmov 0.0   ;;  %vm275_vm1 = vmmov 0  }
  0x27   :  { %181 = vmatprep.subr.bf16.mxu0 %v273_v0  ;;  %43 = vst.msk [vmem:[#allocation2] sm:$0xff] %vm42_vm0, %v274_v1  ;;  %178 = vmatprep.mubr.msk.f32.mxu0 %vm275_vm1, %v274_v1  ;;  %vm50_vm2 = vcmask 244736   ;;  %v46_v2 = vld [vmem:[#allocation6] sm:$0xff]  ;;  %v47_v3 = vld [vmem:[#allocation6 + $0x8] sm:$0xff]  ;;  %v48_v5 = vld [vmem:[#allocation6 + $0x10] sm:$0xff]  ;;  %s276_s1 = smov [#allocation8]  }
  0x28   :  { %vm183_vm3 = vmpackc.low %vm50_vm2, %vm50_vm2  ;;  %v182_v4 = vpack.c.bf16 %v47_v3, %v46_v2  ;;  %v49_v6 = vld [vmem:[#allocation6 + $0x18] sm:$0xff]  ;;  %s150_s6 = sshll.u32 %s276_s1, 4  ;;  %s151_s6 = int_to_ptr.vmem [resolvable:$true] %s150_s6 }
  0x29   :  { %v186_v7 = vpack.c.bf16 %v49_v6, %v48_v5  ;;  %v45_v8 = vld [vmem:[#allocation3] sm:$0xff]  ;;  %s241_s7 = scalar_lea.vmem %s151_s6, 128  ;;  %p246_p3 = scmp.lt.s32.totalorder %s151_s6, %s151_s6 }
  0x2a   :  { %184 = vmatpush3.bf16.xpose.msk.msra.mxu0 %vm183_vm3, %v182_v4  ;;  %p242_p2 = scmp.ne.s32.totalorder %s151_s6, %s241_s7  ;;  %p247_p4 = scmp.lt.s32.totalorder %s241_s7, %s241_s7 }
  0x2b   :  { %185 = vmatprep.subr.bf16.mxu0 %v273_v0 }
  0x2c   :  { %p248_p5 = por %p247_p4, %p246_p3 }
  0x2e   :  { %v44_v9 = vld [vmem:[#allocation2] sm:$0xff]  ;;  %p249_p6 = pnand %p248_p5, %p242_p2 }
  0x32   :  { %188 = vmatpush3.bf16.xpose.msk.msra.mxu0 %vm183_vm3, %v186_v7 }
  0x39   :  { %179 = vmatmul.mubr.msk.f32.vlgmr.msra.gmra.mrb[0].mxu0 %vm50_vm2, %v45_v8 }
 0x10c   :  { %v132_v10 = vpop.f32.mrb[0].mxu0 }
 0x10d   :  { %v136_v11 = vadd.f32 %v132_v10, %v44_v9  ;;  %v180_v12 = vpop.f32.mrb[1].mxu0 }
 0x10f   :  { %138 = vst.msk [vmem:[#allocation2] sm:$0xff] %vm42_vm0, %v136_v11 }
 0x116   :  { %v142_v13 = vld [vmem:[#allocation2] sm:$0xff] }
 0x117   :  { %143 = vst.msk [vmem:[#allocation8] sm:$0xff] %vm42_vm0, %v142_v13 }
 0x118   :  { %252 = shalt.err (!%p249_p6)
}
 0x119   :  { %s253_s10 = scalar_lea.hbm %s340_s2, 128 }
 0x11a   :  { %p254_p7 = scmp.ne.s32.totalorder %s340_s2, %s253_s10  ;;  %p257_p8 = scmp.lt.u32.totalorder %s253_s10, %s340_s2 }
 0x11c   :  { %p259_p9 = pnand %p257_p8, %p254_p7 }
 0x11e   :  { %262 = shalt.err (!%p259_p9)
}
 0x11f   :  { %153 = dma.vmem_to_hbm [thread:$0]  %s151_s6, 128, %s340_s2, [#allocation5]  }
 0x120   :  { %267 = dma.done.wait [#allocation5], 128  }
 0x121   :  { %268 = vsyncadd [#allocation5], 4294967168 }
 0x122   :  { %157 = vsyncpa [#allocation4], 1 }
 0x123   :  { %158 = vsyncpa [#allocation7], 1 }
 0x124   :  { %159 = vsyncpa [#allocation5], 1 }

</bundles_post_ra>
